<compile_context>
chip_gen: v5e
topology: v5e:2x2
jax: 0.10.0
libtpu: 0.0.40
codegen_flags: <defaults>
</compile_context>

<pallas_src>
import numpy as np
import jax
import jax.numpy as jnp
from jax.experimental import pallas as pl
from jax.experimental.pallas import tpu as pltpu


def _round_up(x, m):
    return ((x + m - 1) // m) * m


def feature_extractor_kernel(
    xh_ref,     # (bB, D+1)       [hps | budget]
    cur_ref,    # (bB, L)         learning curves
    t1_ref,     # (L, C*L)        conv1 banded weight ('same' pad folded in)
    b1v_ref,    # (1, C*L)        conv1 bias, tiled per channel block
    t2e_ref,    # (C*L, C*L//2)   conv2 banded weight -> even pool-pair element
    t2o_ref,    # (C*L, C*L//2)   conv2 banded weight -> odd  pool-pair element
    b2h_ref,    # (1, C*L//2)     conv2 bias, tiled per channel block
    wfc_ref,    # (C*L//2, E)     ConvNet fc1 weight (PyTorch flatten order)
    bfc_ref,    # (1, E)
    wf1x_ref,   # (D+1, H)        fc1, [hps|budget] slice
    wf1e_ref,   # (E, H)          fc1, curve-embedding slice
    bf1_ref,    # (1, H)
    wf3_ref,    # (H, O)
    bf3_ref,    # (1, O)
    out_ref,    # (bB, O)
):
    f32 = jnp.float32

    # ---- Conv1d(1->C, k=3, 'same') + ReLU: one lane-dense banded matmul --------
    # Lane index of h1 is c*L + l (batch on sublanes, channel*length on lanes).
    h1 = jnp.dot(cur_ref[...], t1_ref[...], preferred_element_type=f32) + b1v_ref[...]
    h1 = jnp.maximum(h1, 0.0)                                   # (bB, C*L)

    # ---- Conv1d(C->C, k=3, 'same') + MaxPool1d(2) ------------------------------
    # Two banded matmuls give conv2 output at the even / odd position of each pool
    # pair directly in the channel-major flatten layout (lane index c*(L//2)+p);
    # the pool is then a plain lane-wise max.  Dropout1d is identity in eval mode.
    # TODO(synk): Dropout1d(0.25) training-mode channel masking not implemented.
    a = jnp.dot(h1, t2e_ref[...], preferred_element_type=f32)
    b = jnp.dot(h1, t2o_ref[...], preferred_element_type=f32)
    pooled = jnp.maximum(jnp.maximum(a, b) + b2h_ref[...], 0.0)  # flatten + ReLU

    # ---- ConvNet Linear(200, E) + ReLU ------------------------------------------
    emb = jnp.dot(pooled, wfc_ref[...], preferred_element_type=f32) + bfc_ref[...]
    emb = jnp.maximum(emb, 0.0)                                  # (bB, E)

    # ---- x = [hps | budget | emb]; fc1 -> LeakyReLU(0.01) -> fc3 (fc2 unused) ----
    h = (jnp.dot(xh_ref[...], wf1x_ref[...], preferred_element_type=f32)
         + jnp.dot(emb, wf1e_ref[...], preferred_element_type=f32)
         + bf1_ref[...])
    h = jnp.where(h > 0.0, h, 0.01 * h)
    out_ref[...] = (jnp.dot(h, wf3_ref[...], preferred_element_type=f32)
                    + bf3_ref[...]).astype(out_ref.dtype)


def init_params(key, hps_dim, hidden_dim=128, output_dim=32,
                output_dim_curves=16, conv_channels=8, kernel_size=3, curve_len=50):
    """PyTorch-shaped parameters, deterministic init.

    FeatureExtractor is used with configuration['input_dim_hps'] = hps_dim + 1
    (budget column included), so fc1 in_features = hps_dim + 1 + output_dim_curves.
    fc2 and fc_metafeatures exist in the module but are unused in this forward path.
    """
    ks = jax.random.split(key, 10)
    w = lambda k, shape: 0.1 * jax.random.normal(k, shape, jnp.float32)
    flat_dim = conv_channels * (curve_len // 2)        # 8 * 25 = 200 == nn.Linear(200, out)
    assert flat_dim == 200, "ConvNet hardcodes Linear(200, out) -> curve length must be 50"
    return {
        "conv1_w": w(ks[0], (conv_channels, 1, kernel_size)),
        "conv1_b": w(ks[1], (conv_channels,)),
        "conv2_w": w(ks[2], (conv_channels, conv_channels, kernel_size)),
        "conv2_b": w(ks[3], (conv_channels,)),
        "convfc_w": w(ks[4], (output_dim_curves, flat_dim)),
        "convfc_b": w(ks[5], (output_dim_curves,)),
        "fc1_w": w(ks[6], (hidden_dim, hps_dim + 1 + output_dim_curves)),
        "fc1_b": w(ks[7], (hidden_dim,)),
        "fc3_w": w(ks[8], (output_dim, hidden_dim)),
        "fc3_b": w(ks[9], (output_dim,)),
    }


def feature_extractor_forward(hps, budgets, curves, params, *, max_block_b=512):
    B, D = hps.shape
    if curves.ndim == 3:                  # (B, 1, L) -> (B, L); input_dim_curves == 1
        curves = curves[:, 0, :]
    L = curves.shape[1]
    C, _, K = params["conv1_w"].shape
    E = params["convfc_w"].shape[0]
    H = params["fc1_w"].shape[0]
    O = params["fc3_w"].shape[0]
    Lh = L // 2
    CL, CLh = C * L, C * Lh
    hi = jax.lax.Precision.HIGHEST        # exact (f32) banded-weight construction

    f32 = jnp.float32
    hps = hps.astype(f32)
    curves = curves.astype(f32)
    budgets = budgets.reshape(B, 1).astype(f32)
    xh = jnp.concatenate([hps, budgets], axis=1)          # (B, D+1)

    # Sublane-aligned batch blocks.  For larger batches keep >=2 grid blocks so
    # dimension_semantics=("parallel",) can use both TensorCores on v7x; per-block
    # VMEM after the lane-dense re-layout is only a few MiB, well under the 32 MiB
    # default scoped limit on every generation.
    if B <= 8:
        block_b = 8
    else:
        block_b = min(max_block_b, _round_up(pl.cdiv(B, 2), 8))
    B_pad = _round_up(B, block_b)
    if B_pad != B:
        xh = jnp.pad(xh, ((0, B_pad - B), (0, 0)))
        curves = jnp.pad(curves, ((0, B_pad - B), (0, 0)))

    # -------- one-time weight re-layout (plain XLA, tiny) ---------------------------
    # Banded selector matrices: tap k of a 'same' k=3 conv reads input position
    # j + k - 1 when producing output position j; out-of-range taps are omitted,
    # which implements the zero padding exactly.
    li = np.arange(L)[:, None]
    lo = np.arange(L)[None, :]
    po = np.arange(Lh)[None, :]
    sel1 = np.stack([(li == lo + k - 1) for k in range(K)]).astype(np.float32)      # (K,L,L)
    sel_e = np.stack([(li == 2 * po + k - 1) for k in range(K)]).astype(np.float32)  # (K,L,Lh)
    sel_o = np.stack([(li == 2 * po + k) for k in range(K)]).astype(np.float32)      # (K,L,Lh)

    w1_ck = params["conv1_w"][:, 0, :]                                       # (C, K)
    t1 = jnp.einsum("kij,ck->icj", jnp.asarray(sel1), w1_ck,
                    precision=hi).reshape(L, CL)                             # (L, C*L)
    b1v = jnp.repeat(params["conv1_b"], L).reshape(1, CL)

    w2_dck = params["conv2_w"]                                               # (Cout, Cin, K)
    t2e = jnp.einsum("kip,dck->cidp", jnp.asarray(sel_e), w2_dck,
                     precision=hi).reshape(CL, CLh)                          # even pool element
    t2o = jnp.einsum("kip,dck->cidp", jnp.asarray(sel_o), w2_dck,
                     precision=hi).reshape(CL, CLh)                          # odd pool element
    b2h = jnp.repeat(params["conv2_b"], Lh).reshape(1, CLh)

    wfc = jnp.transpose(params["convfc_w"], (1, 0))                          # (C*L//2, E)
    bfc = params["convfc_b"].reshape(1, E)
    wf1 = jnp.transpose(params["fc1_w"], (1, 0))                             # (D+1+E, H)
    wf1x, wf1e = wf1[:D + 1, :], wf1[D + 1:, :]
    bf1 = params["fc1_b"].reshape(1, H)
    wf3 = jnp.transpose(params["fc3_w"], (1, 0))                             # (H, O)
    bf3 = params["fc3_b"].reshape(1, O)

    batched = lambda i: (i, 0)
    const = lambda i: (0, 0)
    out = pl.pallas_call(
        feature_extractor_kernel,
        out_shape=jax.ShapeDtypeStruct((B_pad, O), jnp.float32),
        grid_spec=pltpu.PrefetchScalarGridSpec(
            num_scalar_prefetch=0,
            grid=(B_pad // block_b,),
            in_specs=[
                pl.BlockSpec((block_b, D + 1), batched),   # xh
                pl.BlockSpec((block_b, L), batched),       # curves
                pl.BlockSpec((L, CL), const),              # t1
                pl.BlockSpec((1, CL), const),              # b1v
                pl.BlockSpec((CL, CLh), const),            # t2e
                pl.BlockSpec((CL, CLh), const),            # t2o
                pl.BlockSpec((1, CLh), const),             # b2h
                pl.BlockSpec((CLh, E), const),             # wfc
                pl.BlockSpec((1, E), const),               # bfc
                pl.BlockSpec((D + 1, H), const),           # fc1 [hps|budget] part
                pl.BlockSpec((E, H), const),               # fc1 emb part
                pl.BlockSpec((1, H), const),               # fc1 bias
                pl.BlockSpec((H, O), const),               # fc3
                pl.BlockSpec((1, O), const),               # fc3 bias
            ],
            out_specs=pl.BlockSpec((block_b, O), batched),
        ),
        compiler_params=pltpu.CompilerParams(
            dimension_semantics=("parallel",)),
    )(xh, curves, t1, b1v, t2e, t2o, b2h, wfc, bfc, wf1x, wf1e, bf1, wf3, bf3)
    return out[:B, :]


def reference_forward(hps, budgets, curves, params):
    """Pure-JAX (NCL, PyTorch-equivalent) reference."""
    hi = jax.lax.Precision.HIGHEST
    B = hps.shape[0]
    budgets = budgets.reshape(B, 1)
    if curves.ndim == 2:
        curves = curves[:, None, :]
    dn = ("NCH", "OIH", "NCH")
    y = jax.lax.conv_general_dilated(curves, params["conv1_w"], (1,), "SAME",
                                     dimension_numbers=dn, precision=hi)
    y = jnp.maximum(y + params["conv1_b"][None, :, None], 0.0)
    y = jax.lax.conv_general_dilated(y, params["conv2_w"], (1,), "SAME",
                                     dimension_numbers=dn, precision=hi)
    y = y + params["conv2_b"][None, :, None]
    Bc, C, L = y.shape
    y = jnp.max(y.reshape(Bc, C, L // 2, 2), axis=3)
    flat = jnp.maximum(y.reshape(B, -1), 0.0)
    emb = jnp.maximum(jnp.dot(flat, params["convfc_w"].T, precision=hi)
                      + params["convfc_b"], 0.0)
    x = jnp.concatenate([hps, budgets, emb], axis=1)
    h = jnp.dot(x, params["fc1_w"].T, precision=hi) + params["fc1_b"]
    h = jnp.where(h > 0.0, h, 0.01 * h)
    return jnp.dot(h, params["fc3_w"].T, precision=hi) + params["fc3_b"]


if __name__ == "__main__":
    key = jax.random.PRNGKey(0)
    B, D_HPS, CURVE_LEN = 4, 12, 50   # curve length 50 -> 8 * 25 = 200 = ConvNet Linear(200, 16)
    k_hps, k_bud, k_cur, k_par = jax.random.split(key, 4)
    hps = jax.random.uniform(k_hps, (B, D_HPS), jnp.float32)
    budgets = jax.random.uniform(k_bud, (B,), jnp.float32)
    curves = jax.random.uniform(k_cur, (B, CURVE_LEN), jnp.float32)
    params = init_params(k_par, D_HPS, curve_len=CURVE_LEN)

    out = feature_extractor_forward(hps, budgets, curves, params)
    out = jax.block_until_ready(out)

    ref = reference_forward(hps, budgets, curves, params)
    np.testing.assert_allclose(np.asarray(out), np.asarray(ref), rtol=2e-2, atol=2e-2)
    print("KERNEL_OK")
</pallas_src>

<mosaic_0001>
module attributes {stable_mosaic.version = 11 : i64} {
  func.func @feature_extractor_kernel(%arg0: i32, %arg1: memref<8x13xf32, #tpu.memory_space<vmem>>, %arg2: memref<8x50xf32, #tpu.memory_space<vmem>>, %arg3: memref<50x400xf32, #tpu.memory_space<vmem>>, %arg4: memref<1x400xf32, #tpu.memory_space<vmem>>, %arg5: memref<400x200xf32, #tpu.memory_space<vmem>>, %arg6: memref<400x200xf32, #tpu.memory_space<vmem>>, %arg7: memref<1x200xf32, #tpu.memory_space<vmem>>, %arg8: memref<200x16xf32, #tpu.memory_space<vmem>>, %arg9: memref<1x16xf32, #tpu.memory_space<vmem>>, %arg10: memref<13x128xf32, #tpu.memory_space<vmem>>, %arg11: memref<16x128xf32, #tpu.memory_space<vmem>>, %arg12: memref<1x128xf32, #tpu.memory_space<vmem>>, %arg13: memref<128x32xf32, #tpu.memory_space<vmem>>, %arg14: memref<1x32xf32, #tpu.memory_space<vmem>>, %arg15: memref<8x32xf32, #tpu.memory_space<vmem>>) attributes {dimension_semantics = [#tpu.dimension_semantics<parallel>], iteration_bounds = array<i64: 1>, scalar_prefetch = 0 : i64, scratch_operands = 0 : i64, tpu.core_type = #tpu.core_type<tc>, window_params = [{transform_indices = @transform_0, window_bounds = array<i64: 8, 13>}, {transform_indices = @transform_1, window_bounds = array<i64: 8, 50>}, {pipeline_mode = #tpu.pipeline_mode<synchronous>, transform_indices = @transform_2, window_bounds = array<i64: 50, 400>}, {pipeline_mode = #tpu.pipeline_mode<synchronous>, transform_indices = @transform_3, window_bounds = array<i64: 1, 400>}, {pipeline_mode = #tpu.pipeline_mode<synchronous>, transform_indices = @transform_4, window_bounds = array<i64: 400, 200>}, {pipeline_mode = #tpu.pipeline_mode<synchronous>, transform_indices = @transform_5, window_bounds = array<i64: 400, 200>}, {pipeline_mode = #tpu.pipeline_mode<synchronous>, transform_indices = @transform_6, window_bounds = array<i64: 1, 200>}, {pipeline_mode = #tpu.pipeline_mode<synchronous>, transform_indices = @transform_7, window_bounds = array<i64: 200, 16>}, {pipeline_mode = #tpu.pipeline_mode<synchronous>, transform_indices = @transform_8, window_bounds = array<i64: 1, 16>}, {pipeline_mode = #tpu.pipeline_mode<synchronous>, transform_indices = @transform_9, window_bounds = array<i64: 13, 128>}, {pipeline_mode = #tpu.pipeline_mode<synchronous>, transform_indices = @transform_10, window_bounds = array<i64: 16, 128>}, {pipeline_mode = #tpu.pipeline_mode<synchronous>, transform_indices = @transform_11, window_bounds = array<i64: 1, 128>}, {pipeline_mode = #tpu.pipeline_mode<synchronous>, transform_indices = @transform_12, window_bounds = array<i64: 128, 32>}, {pipeline_mode = #tpu.pipeline_mode<synchronous>, transform_indices = @transform_13, window_bounds = array<i64: 1, 32>}, {transform_indices = @transform_14, window_bounds = array<i64: 8, 32>}]} {
    %c0 = arith.constant 0 : index
    %c0_0 = arith.constant 0 : index
    %0 = vector.load %arg2[%c0, %c0_0] : memref<8x50xf32, #tpu.memory_space<vmem>>, vector<8x50xf32>
    %c0_1 = arith.constant 0 : index
    %c0_2 = arith.constant 0 : index
    %1 = vector.load %arg3[%c0_1, %c0_2] : memref<50x400xf32, #tpu.memory_space<vmem>>, vector<50x400xf32>
    %cst = arith.constant dense<0.000000e+00> : vector<8x400xf32>
    %2 = tpu.matmul %0, %1, %cst {dimension_numbers = #tpu.dot_dimension_numbers<[1], [0], [0], [1], [0, 0, 1, 1], [], []>} : vector<8x50xf32>, vector<50x400xf32>, vector<8x400xf32> -> vector<8x400xf32>
    %c0_3 = arith.constant 0 : index
    %c0_4 = arith.constant 0 : index
    %3 = vector.load %arg4[%c0_3, %c0_4] : memref<1x400xf32, #tpu.memory_space<vmem>>, vector<1x400xf32>
    %4 = vector.broadcast %3 : vector<1x400xf32> to vector<8x400xf32>
    %5 = arith.addf %2, %4 : vector<8x400xf32>
    %cst_5 = arith.constant 0.000000e+00 : f32
    %6 = vector.broadcast %cst_5 : f32 to vector<8x400xf32>
    %7 = arith.maximumf %5, %6 : vector<8x400xf32>
    %c0_6 = arith.constant 0 : index
    %c0_7 = arith.constant 0 : index
    %8 = vector.load %arg5[%c0_6, %c0_7] : memref<400x200xf32, #tpu.memory_space<vmem>>, vector<400x200xf32>
    %cst_8 = arith.constant dense<0.000000e+00> : vector<8x200xf32>
    %9 = tpu.matmul %7, %8, %cst_8 {dimension_numbers = #tpu.dot_dimension_numbers<[1], [0], [0], [1], [0, 0, 1, 1], [], []>} : vector<8x400xf32>, vector<400x200xf32>, vector<8x200xf32> -> vector<8x200xf32>
    %c0_9 = arith.constant 0 : index
    %c0_10 = arith.constant 0 : index
    %10 = vector.load %arg6[%c0_9, %c0_10] : memref<400x200xf32, #tpu.memory_space<vmem>>, vector<400x200xf32>
    %cst_11 = arith.constant dense<0.000000e+00> : vector<8x200xf32>
    %11 = tpu.matmul %7, %10, %cst_11 {dimension_numbers = #tpu.dot_dimension_numbers<[1], [0], [0], [1], [0, 0, 1, 1], [], []>} : vector<8x400xf32>, vector<400x200xf32>, vector<8x200xf32> -> vector<8x200xf32>
    %12 = arith.maximumf %9, %11 : vector<8x200xf32>
    %c0_12 = arith.constant 0 : index
    %c0_13 = arith.constant 0 : index
    %13 = vector.load %arg7[%c0_12, %c0_13] : memref<1x200xf32, #tpu.memory_space<vmem>>, vector<1x200xf32>
    %14 = vector.broadcast %13 : vector<1x200xf32> to vector<8x200xf32>
    %15 = arith.addf %12, %14 : vector<8x200xf32>
    %cst_14 = arith.constant 0.000000e+00 : f32
    %16 = vector.broadcast %cst_14 : f32 to vector<8x200xf32>
    %17 = arith.maximumf %15, %16 : vector<8x200xf32>
    %c0_15 = arith.constant 0 : index
    %c0_16 = arith.constant 0 : index
    %18 = vector.load %arg8[%c0_15, %c0_16] : memref<200x16xf32, #tpu.memory_space<vmem>>, vector<200x16xf32>
    %cst_17 = arith.constant dense<0.000000e+00> : vector<8x16xf32>
    %19 = tpu.matmul %17, %18, %cst_17 {dimension_numbers = #tpu.dot_dimension_numbers<[1], [0], [0], [1], [0, 0, 1, 1], [], []>} : vector<8x200xf32>, vector<200x16xf32>, vector<8x16xf32> -> vector<8x16xf32>
    %c0_18 = arith.constant 0 : index
    %c0_19 = arith.constant 0 : index
    %20 = vector.load %arg9[%c0_18, %c0_19] : memref<1x16xf32, #tpu.memory_space<vmem>>, vector<1x16xf32>
    %21 = vector.broadcast %20 : vector<1x16xf32> to vector<8x16xf32>
    %22 = arith.addf %19, %21 : vector<8x16xf32>
    %cst_20 = arith.constant 0.000000e+00 : f32
    %23 = vector.broadcast %cst_20 : f32 to vector<8x16xf32>
    %24 = arith.maximumf %22, %23 : vector<8x16xf32>
    %c0_21 = arith.constant 0 : index
    %c0_22 = arith.constant 0 : index
    %25 = vector.load %arg1[%c0_21, %c0_22] : memref<8x13xf32, #tpu.memory_space<vmem>>, vector<8x13xf32>
    %c0_23 = arith.constant 0 : index
    %c0_24 = arith.constant 0 : index
    %26 = vector.load %arg10[%c0_23, %c0_24] : memref<13x128xf32, #tpu.memory_space<vmem>>, vector<13x128xf32>
    %cst_25 = arith.constant dense<0.000000e+00> : vector<8x128xf32>
    %27 = tpu.matmul %25, %26, %cst_25 {dimension_numbers = #tpu.dot_dimension_numbers<[1], [0], [0], [1], [0, 0, 1, 1], [], []>} : vector<8x13xf32>, vector<13x128xf32>, vector<8x128xf32> -> vector<8x128xf32>
    %c0_26 = arith.constant 0 : index
    %c0_27 = arith.constant 0 : index
    %28 = vector.load %arg11[%c0_26, %c0_27] : memref<16x128xf32, #tpu.memory_space<vmem>>, vector<16x128xf32>
    %cst_28 = arith.constant dense<0.000000e+00> : vector<8x128xf32>
    %29 = tpu.matmul %24, %28, %cst_28 {dimension_numbers = #tpu.dot_dimension_numbers<[1], [0], [0], [1], [0, 0, 1, 1], [], []>} : vector<8x16xf32>, vector<16x128xf32>, vector<8x128xf32> -> vector<8x128xf32>
    %30 = arith.addf %27, %29 : vector<8x128xf32>
    %c0_29 = arith.constant 0 : index
    %c0_30 = arith.constant 0 : index
    %31 = vector.load %arg12[%c0_29, %c0_30] : memref<1x128xf32, #tpu.memory_space<vmem>>, vector<1x128xf32>
    %32 = vector.broadcast %31 : vector<1x128xf32> to vector<8x128xf32>
    %33 = arith.addf %30, %32 : vector<8x128xf32>
    %cst_31 = arith.constant 0.000000e+00 : f32
    %34 = vector.broadcast %cst_31 : f32 to vector<8x128xf32>
    %35 = arith.cmpf ogt, %33, %34 : vector<8x128xf32>
    %cst_32 = arith.constant 0.00999999977 : f32
    %36 = vector.broadcast %cst_32 : f32 to vector<8x128xf32>
    %37 = arith.mulf %36, %33 : vector<8x128xf32>
    %38 = arith.select %35, %33, %37 : vector<8x128xi1>, vector<8x128xf32>
    %c0_33 = arith.constant 0 : index
    %c0_34 = arith.constant 0 : index
    %39 = vector.load %arg13[%c0_33, %c0_34] : memref<128x32xf32, #tpu.memory_space<vmem>>, vector<128x32xf32>
    %cst_35 = arith.constant dense<0.000000e+00> : vector<8x32xf32>
    %40 = tpu.matmul %38, %39, %cst_35 {dimension_numbers = #tpu.dot_dimension_numbers<[1], [0], [0], [1], [0, 0, 1, 1], [], []>} : vector<8x128xf32>, vector<128x32xf32>, vector<8x32xf32> -> vector<8x32xf32>
    %c0_36 = arith.constant 0 : index
    %c0_37 = arith.constant 0 : index
    %41 = vector.load %arg14[%c0_36, %c0_37] : memref<1x32xf32, #tpu.memory_space<vmem>>, vector<1x32xf32>
    %42 = vector.broadcast %41 : vector<1x32xf32> to vector<8x32xf32>
    %43 = arith.addf %40, %42 : vector<8x32xf32>
    %c0_38 = arith.constant 0 : index
    %c0_39 = arith.constant 0 : index
    %44 = vector.load %arg15[%c0_38, %c0_39] : memref<8x32xf32, #tpu.memory_space<vmem>>, vector<8x32xf32>
    tpu.vector_store %arg15[%c0_38, %c0_39], %43 {strides = array<i32>} : memref<8x32xf32, #tpu.memory_space<vmem>>, vector<8x32xf32>,
    return
  }
  func.func @transform_0(%arg0: i32) -> (i32, i32) {
    %c0_i32 = arith.constant 0 : i32
    %c0_i32_0 = arith.constant 0 : i32
    return %arg0, %c0_i32 : i32, i32
  }
  func.func @transform_1(%arg0: i32) -> (i32, i32) {
    %c0_i32 = arith.constant 0 : i32
    %c0_i32_0 = arith.constant 0 : i32
    return %arg0, %c0_i32 : i32, i32
  }
  func.func @transform_2(%arg0: i32) -> (i32, i32) {
    %c0_i32 = arith.constant 0 : i32
    %c0_i32_0 = arith.constant 0 : i32
    %c0_i32_1 = arith.constant 0 : i32
    return %c0_i32, %c0_i32_0 : i32, i32
  }
  func.func @transform_3(%arg0: i32) -> (i32, i32) {
    %c0_i32 = arith.constant 0 : i32
    %c0_i32_0 = arith.constant 0 : i32
    %c0_i32_1 = arith.constant 0 : i32
    return %c0_i32, %c0_i32_0 : i32, i32
  }
  func.func @transform_4(%arg0: i32) -> (i32, i32) {
    %c0_i32 = arith.constant 0 : i32
    %c0_i32_0 = arith.constant 0 : i32
    %c0_i32_1 = arith.constant 0 : i32
    return %c0_i32, %c0_i32_0 : i32, i32
  }
  func.func @transform_5(%arg0: i32) -> (i32, i32) {
    %c0_i32 = arith.constant 0 : i32
    %c0_i32_0 = arith.constant 0 : i32
    %c0_i32_1 = arith.constant 0 : i32
    return %c0_i32, %c0_i32_0 : i32, i32
  }
  func.func @transform_6(%arg0: i32) -> (i32, i32) {
    %c0_i32 = arith.constant 0 : i32
    %c0_i32_0 = arith.constant 0 : i32
    %c0_i32_1 = arith.constant 0 : i32
    return %c0_i32, %c0_i32_0 : i32, i32
  }
  func.func @transform_7(%arg0: i32) -> (i32, i32) {
    %c0_i32 = arith.constant 0 : i32
    %c0_i32_0 = arith.constant 0 : i32
    %c0_i32_1 = arith.constant 0 : i32
    return %c0_i32, %c0_i32_0 : i32, i32
  }
  func.func @transform_8(%arg0: i32) -> (i32, i32) {
    %c0_i32 = arith.constant 0 : i32
    %c0_i32_0 = arith.constant 0 : i32
    %c0_i32_1 = arith.constant 0 : i32
    return %c0_i32, %c0_i32_0 : i32, i32
  }
  func.func @transform_9(%arg0: i32) -> (i32, i32) {
    %c0_i32 = arith.constant 0 : i32
    %c0_i32_0 = arith.constant 0 : i32
    %c0_i32_1 = arith.constant 0 : i32
    return %c0_i32, %c0_i32_0 : i32, i32
  }
  func.func @transform_10(%arg0: i32) -> (i32, i32) {
    %c0_i32 = arith.constant 0 : i32
    %c0_i32_0 = arith.constant 0 : i32
    %c0_i32_1 = arith.constant 0 : i32
    return %c0_i32, %c0_i32_0 : i32, i32
  }
  func.func @transform_11(%arg0: i32) -> (i32, i32) {
    %c0_i32 = arith.constant 0 : i32
    %c0_i32_0 = arith.constant 0 : i32
    %c0_i32_1 = arith.constant 0 : i32
    return %c0_i32, %c0_i32_0 : i32, i32
  }
  func.func @transform_12(%arg0: i32) -> (i32, i32) {
    %c0_i32 = arith.constant 0 : i32
    %c0_i32_0 = arith.constant 0 : i32
    %c0_i32_1 = arith.constant 0 : i32
    return %c0_i32, %c0_i32_0 : i32, i32
  }
  func.func @transform_13(%arg0: i32) -> (i32, i32) {
    %c0_i32 = arith.constant 0 : i32
    %c0_i32_0 = arith.constant 0 : i32
    %c0_i32_1 = arith.constant 0 : i32
    return %c0_i32, %c0_i32_0 : i32, i32
  }
  func.func @transform_14(%arg0: i32) -> (i32, i32) {
    %c0_i32 = arith.constant 0 : i32
    %c0_i32_0 = arith.constant 0 : i32
    return %arg0, %c0_i32 : i32, i32
  }
}

</mosaic_0001>

<bundles_post_ra>
// kernel: tpu_custom_call.1
= control target key start
LH: loop header
LB: loop body
LE: loop exit
PB: predicated region body
PF: predicated region fallthrough
CT: control target
= control target key end

     0   :  { %19 = vsyncpa [#allocation3], 0  ;;  %s1428_s0 = inlined_call_operand.vmem [shape: f32[8,13], index: 0, kind: input, shape index: {}]   ;;  %s1429_s1 = inlined_call_operand.vmem [shape: f32[8,50], index: 1, kind: input, shape index: {}]   ;;  %s1430_s2 = inlined_call_operand.vmem [shape: f32[50,400], index: 2, kind: input, shape index: {}]   ;;  %s1431_s3 = inlined_call_operand.vmem [shape: f32[1,400], index: 3, kind: input, shape index: {}]   ;;  %s1432_s4 = inlined_call_operand.hbm [shape: f32[400,200], index: 4, kind: input, shape index: {}]   ;;  %s1433_s5 = inlined_call_operand.hbm [shape: f32[400,200], index: 5, kind: input, shape index: {}]   ;;  %s1434_s6 = inlined_call_operand.vmem [shape: f32[1,200], index: 6, kind: input, shape index: {}]   ;;  %s1435_s7 = inlined_call_operand.vmem [shape: f32[200,16], index: 7, kind: input, shape index: {}]   ;;  %s1436_s8 = inlined_call_operand.vmem [shape: f32[1,16], index: 8, kind: input, shape index: {}]   ;;  %s1437_s9 = inlined_call_operand.vmem [shape: f32[13,128], index: 9, kind: input, shape index: {}]   ;;  %s1438_s10 = inlined_call_operand.vmem [shape: f32[16,128], index: 10, kind: input, shape index: {}]   ;;  %s1439_s11 = inlined_call_operand.vmem [shape: f32[1,128], index: 11, kind: input, shape index: {}]   ;;  %s1440_s12 = inlined_call_operand.vmem [shape: f32[128,32], index: 12, kind: input, shape index: {}]   ;;  %s1441_s13 = inlined_call_operand.vmem [shape: f32[1,32], index: 13, kind: input, shape index: {}]   ;;  %s1442_s14 = inlined_call_operand.hbm [shape: f32[8,32], index: 14, kind: output, shape index: {}]  }
   0x1   :  { %20 = vsyncpa [#allocation6], 0 }
   0x2   :  { %21 = vsyncpa [#allocation4], 0  ;;  %s34_s15 = sshll.u32 %s1432_s4, 4  ;;  %s1056_s16 = smov [#allocation2]   ;;  %s35_s15 = int_to_ptr.hbm [resolvable:$true] %s34_s15 }
   0x3   :  { %s36_s17 = sshll.u32 %s1056_s16, 4  ;;  %s47_s20 = sshll.u32 %s1433_s5, 4  ;;  %s37_s17 = int_to_ptr.vmem [resolvable:$true] %s36_s17  ;;  %s48_s20 = int_to_ptr.hbm [resolvable:$true] %s47_s20 }
   0x4   :  { %s1057_s21 = smov 256   ;;  %s1058_s22 = smov 16  }
   0x5   :  { %42 = dma.hbm_to_vmem [thread:$0]  %s35_s15, 12800, %s37_s17, [#allocation3], %s1057_s21, %s1057_s21, %s1058_s22  }
   0x6   :  { %s1059_s23 = smov [#allocation5]  }
   0x7   :  { %s49_s24 = sshll.u32 %s1059_s23, 4  ;;  %s50_s24 = int_to_ptr.vmem [resolvable:$true] %s49_s24 }
   0x8   :  { %55 = dma.hbm_to_vmem [thread:$0]  %s48_s20, 12800, %s50_s24, [#allocation6], %s1057_s21, %s1057_s21, %s1058_s22  }
   0x9   :  { %1050 = dma.done.wait [#allocation3], 12800  }
   0xa   :  { %1051 = vsyncadd [#allocation3], 4294954496 }
   0xb   :  { %1052 = dma.done.wait [#allocation6], 12800  }
   0xc   :  { %1053 = vsyncadd [#allocation6], 4294954496  ;;  %vm123_vm0 = vcmask 1041408   ;;  %v105_v0 = vld [vmem:[%s1430_s2 + $0xc0] sm:$0x3]  ;;  %v102_v4 = vld [vmem:[%s1430_s2 + $0xa8] sm:$0xff] }
   0xd   :  { %v106_v1 = vld [vmem:[%s1430_s2 + $0xc8] sm:$0x3]  ;;  %v107_v2 = vld [vmem:[%s1430_s2 + $0xd0] sm:$0x3]  ;;  %954 = vmatpush.msk.msra.mxu0 %vm123_vm0, %v105_v0  ;;  %v101_v3 = vld [vmem:[%s1430_s2 + $0xa0] sm:$0xff]  ;;  %vm119_vm1 = vcmask 408576  }
   0xe   :  { %956 = vmatpush.msk.msra.mxu1 %vm123_vm0, %v106_v1  ;;  %v103_v5 = vld [vmem:[%s1430_s2 + $0xb0] sm:$0xff]  ;;  %958 = vmatpush.msk.msra.mxu3 %vm123_vm0, %v107_v2  ;;  %v97_v6 = vld [vmem:[%s1430_s2 + $0x80] sm:$0xff]  ;;  %v98_v7 = vld [vmem:[%s1430_s2 + $0x88] sm:$0xff]  ;;  %vm320_vm2 = vcmask 130048   ;;  %vm785_vm3 = vcmask 588800   ;;  %vm862_vm4 = vcmask 1044480  }
   0xf   :  { %146 = vmatpush.msra.mxu0 %v101_v3  ;;  %v99_v8 = vld [vmem:[%s1430_s2 + $0x90] sm:$0xff]  ;;  %v93_v9 = vld [vmem:[%s1430_s2 + $0x60] sm:$0xff]  ;;  %v94_v10 = vld [vmem:[%s1430_s2 + $0x68] sm:$0xff]  ;;  %vm858_vm5 = vcmask 105472   ;;  %s1060_s15 = smov [#allocation7]   ;;  %s943_s17 = sshll.u32 %s1442_s14, 4  ;;  %s944_s17 = int_to_ptr.hbm [resolvable:$true] %s943_s17 }
  0x10   :  { %166 = vmatpush.msra.mxu1 %v102_v4  ;;  %186 = vmatpush.msra.mxu3 %v103_v5  ;;  %v95_v11 = vld [vmem:[%s1430_s2 + $0x70] sm:$0xff]  ;;  %v89_v12 = vld [vmem:[%s1430_s2 + $0x40] sm:$0xff]  ;;  %v90_v13 = vld [vmem:[%s1430_s2 + $0x48] sm:$0xff]  ;;  %s941_s16 = sshll.u32 %s1060_s15, 4  ;;  %vm934_vm7 = vcmask 261120   ;;  %s942_s16 = int_to_ptr.vmem [resolvable:$true] %s941_s16 }
  0x11   :  { %147 = vmatpush.msra.mxu0 %v97_v6  ;;  %v91_v14 = vld [vmem:[%s1430_s2 + $0x50] sm:$0xff]  ;;  %v85_v15 = vld [vmem:[%s1430_s2 + $0x20] sm:$0xff]  ;;  %v86_v16 = vld [vmem:[%s1430_s2 + $0x28] sm:$0xff] }
  0x12   :  { %167 = vmatpush.msra.mxu1 %v98_v7  ;;  %187 = vmatpush.msra.mxu3 %v99_v8  ;;  %v87_v17 = vld [vmem:[%s1430_s2 + $0x30] sm:$0xff]  ;;  %v81_v18 = vld [vmem:[%s1430_s2] sm:$0xff]  ;;  %v82_v19 = vld [vmem:[%s1430_s2 + $0x8] sm:$0xff] }
  0x13   :  { %148 = vmatpush.msra.mxu0 %v93_v9  ;;  %v83_v20 = vld [vmem:[%s1430_s2 + $0x10] sm:$0xff]  ;;  %v80_v21 = vld [vmem:[%s1429_s1] sm:$0xff]  ;;  %v108_v22 = vld [vmem:[%s1430_s2 + $0xd8] sm:$0x3] }
  0x14   :  { %168 = vmatpush.msra.mxu1 %v94_v10  ;;  %188 = vmatpush.msra.mxu3 %v95_v11  ;;  %v250_v23 = vld [vmem:[#allocation2 + $0xf0] sm:$0xff]  ;;  %v104_v25 = vld [vmem:[%s1430_s2 + $0xb8] sm:$0xff]  ;;  %v248_v26 = vld [vmem:[#allocation2 + $0xe0] sm:$0xff] }
  0x15   :  { %149 = vmatpush.msra.mxu0 %v89_v12  ;;  %v282_v24 = vld [vmem:[#allocation2 + $0x1f0] sm:$0xff]  ;;  %v280_v27 = vld [vmem:[#allocation2 + $0x1e0] sm:$0xff]  ;;  %v100_v28 = vld [vmem:[%s1430_s2 + $0x98] sm:$0xff] }
  0x16   :  { %169 = vmatpush.msra.mxu1 %v90_v13  ;;  %189 = vmatpush.msra.mxu3 %v91_v14  ;;  %v246_v29 = vld [vmem:[#allocation2 + $0xd0] sm:$0xff]  ;;  %v96_v31 = vld [vmem:[%s1430_s2 + $0x78] sm:$0xff]  ;;  %v244_v32 = vld [vmem:[#allocation2 + $0xc0] sm:$0xff] }
  0x17   :  { %150 = vmatpush.msra.mxu0 %v85_v15  ;;  %v278_v30 = vld [vmem:[#allocation2 + $0x1d0] sm:$0xff]  ;;  %v276_v33 = vld [vmem:[#allocation2 + $0x1c0] sm:$0xff]  ;;  %v92_v35 = vld [vmem:[%s1430_s2 + $0x58] sm:$0xff] }
  0x18   :  { %170 = vmatpush.msra.mxu1 %v86_v16  ;;  %190 = vmatpush.msra.mxu3 %v87_v17  ;;  %v314_v34 = vld [vmem:[#allocation2 + $0x2f0] sm:$0xff]  ;;  %v312_v37 = vld [vmem:[#allocation2 + $0x2e0] sm:$0xff]  ;;  %v88_v40 = vld [vmem:[%s1430_s2 + $0x38] sm:$0xff] }
  0x19   :  { %151 = vmatpush.msra.mxu0 %v81_v18  ;;  %v242_v36 = vld [vmem:[#allocation2 + $0xb0] sm:$0xff]  ;;  %364 = vmatpush.msra.mxu2 %v314_v34  ;;  %v240_v41 = vld [vmem:[#allocation2 + $0xa0] sm:$0xff]  ;;  %v84_v44 = vld [vmem:[%s1430_s2 + $0x18] sm:$0xff] }
  0x1a   :  { %171 = vmatpush.msra.mxu1 %v82_v19  ;;  %191 = vmatpush.msra.mxu3 %v83_v20  ;;  %v274_v38 = vld [vmem:[#allocation2 + $0x1b0] sm:$0xff]  ;;  %v272_v42 = vld [vmem:[#allocation2 + $0x1a0] sm:$0xff]  ;;  %v251_v60 = vld [vmem:[#allocation2 + $0xf8] sm:$0xff] }
  0x1b   :  { %955 = vmatmul.msk.f32.vlgmr.msra.gmra.mxu0 %vm119_vm1, %v80_v21  ;;  %957 = vmatmul.msk.f32.vlgmr.msra.gmra.mxu1 %vm119_vm1, %v80_v21  ;;  %v310_v39 = vld [vmem:[#allocation2 + $0x2d0] sm:$0xff]  ;;  %v308_v43 = vld [vmem:[#allocation2 + $0x2c0] sm:$0xff]  ;;  %v249_v0 = vld [vmem:[#allocation2 + $0xe8] sm:$0xff] }
  0x1c   :  { %959 = vmatmul.msk.f32.vlgmr.msra.gmra.mxu3 %vm119_vm1, %v80_v21  ;;  %324 = vmatpush.msrb.mxu0 %v250_v23  ;;  %v238_v45 = vld [vmem:[#allocation2 + $0x90] sm:$0xff]  ;;  %v236_v47 = vld [vmem:[#allocation2 + $0x80] sm:$0xff]  ;;  %v247_v4 = vld [vmem:[#allocation2 + $0xd8] sm:$0xff] }
  0x1d   :  { %960 = vmatpush.msk.msrb.mxu3 %vm123_vm0, %v108_v22  ;;  %344 = vmatpush.msrb.mxu1 %v282_v24  ;;  %v270_v46 = vld [vmem:[#allocation2 + $0x190] sm:$0xff]  ;;  %v268_v49 = vld [vmem:[#allocation2 + $0x180] sm:$0xff]  ;;  %v245_v8 = vld [vmem:[#allocation2 + $0xc8] sm:$0xff] }
  0x1e   :  { %325 = vmatpush.msrb.mxu0 %v248_v26  ;;  %365 = vmatpush.msra.mxu2 %v312_v37  ;;  %v306_v48 = vld [vmem:[#allocation2 + $0x2b0] sm:$0xff]  ;;  %v304_v51 = vld [vmem:[#allocation2 + $0x2a0] sm:$0xff]  ;;  %v283_v14 = vld [vmem:[#allocation2 + $0x1f8] sm:$0xff] }
  0x1f   :  { %206 = vmatpush.msrb.mxu3 %v104_v25  ;;  %345 = vmatpush.msrb.mxu1 %v280_v27  ;;  %v234_v50 = vld [vmem:[#allocation2 + $0x70] sm:$0xff]  ;;  %v232_v54 = vld [vmem:[#allocation2 + $0x60] sm:$0xff]  ;;  %v315_v16 = vld [vmem:[#allocation2 + $0x2f8] sm:$0xff] }
  0x20   :  { %326 = vmatpush.msrb.mxu0 %v246_v29  ;;  %366 = vmatpush.msra.mxu2 %v310_v39  ;;  %v318_v52 = vld [vmem:[#allocation2 + $0x310] sm:$0xff]  ;;  %v316_v56 = vld [vmem:[#allocation2 + $0x300] sm:$0xff]  ;;  %v281_v17 = vld [vmem:[#allocation2 + $0x1e8] sm:$0xff] }
  0x21   :  { %207 = vmatpush.msrb.mxu3 %v100_v28  ;;  %346 = vmatpush.msrb.mxu1 %v278_v30  ;;  %v266_v53 = vld [vmem:[#allocation2 + $0x170] sm:$0xff]  ;;  %v264_v57 = vld [vmem:[#allocation2 + $0x160] sm:$0xff]  ;;  %v313_v18 = vld [vmem:[#allocation2 + $0x2e8] sm:$0xff] }
  0x22   :  { %327 = vmatpush.msrb.mxu0 %v244_v32  ;;  %367 = vmatpush.msra.mxu2 %v308_v43  ;;  %v302_v55 = vld [vmem:[#allocation2 + $0x290] sm:$0xff]  ;;  %v300_v59 = vld [vmem:[#allocation2 + $0x280] sm:$0xff]  ;;  %v279_v19 = vld [vmem:[#allocation2 + $0x1d8] sm:$0xff] }
  0x23   :  { %208 = vmatpush.msrb.mxu3 %v96_v31  ;;  %347 = vmatpush.msrb.mxu1 %v276_v33  ;;  %v230_v58 = vld [vmem:[#allocation2 + $0x50] sm:$0xff]  ;;  %v228_v62 = vld [vmem:[#allocation2 + $0x40] sm:$0xff]  ;;  %v311_v20 = vld [vmem:[#allocation2 + $0x2d8] sm:$0xff] }
  0x24   :  { %328 = vmatpush.msrb.mxu0 %v242_v36  ;;  %368 = vmatpush.msra.mxu2 %v306_v48  ;;  %v262_v61 = vld [vmem:[#allocation2 + $0x150] sm:$0xff]  ;;  %v260_v1 = vld [vmem:[#allocation2 + $0x140] sm:$0xff]  ;;  %v309_v22 = vld [vmem:[#allocation2 + $0x2c8] sm:$0xff] }
  0x25   :  { %209 = vmatpush.msrb.mxu3 %v92_v35  ;;  %348 = vmatpush.msrb.mxu1 %v274_v38  ;;  %v298_v63 = vld [vmem:[#allocation2 + $0x270] sm:$0xff]  ;;  %v296_v3 = vld [vmem:[#allocation2 + $0x260] sm:$0xff]  ;;  %v275_v23 = vld [vmem:[#allocation2 + $0x1b8] sm:$0xff] }
  0x26   :  { %329 = vmatpush.msrb.mxu0 %v240_v41  ;;  %369 = vmatpush.msra.mxu2 %v304_v51  ;;  %v226_v2 = vld [vmem:[#allocation2 + $0x30] sm:$0xff]  ;;  %v224_v6 = vld [vmem:[#allocation2 + $0x20] sm:$0xff]  ;;  %v307_v24 = vld [vmem:[#allocation2 + $0x2b8] sm:$0xff] }
  0x27   :  { %210 = vmatpush.msrb.mxu3 %v88_v40  ;;  %349 = vmatpush.msrb.mxu1 %v272_v42  ;;  %v258_v5 = vld [vmem:[#allocation2 + $0x130] sm:$0xff]  ;;  %v256_v9 = vld [vmem:[#allocation2 + $0x120] sm:$0xff]  ;;  %v273_v25 = vld [vmem:[#allocation2 + $0x1a8] sm:$0xff] }
  0x28   :  { %330 = vmatpush.msrb.mxu0 %v238_v45  ;;  %370 = vmatpush.msra.mxu2 %v302_v55  ;;  %v294_v7 = vld [vmem:[#allocation2 + $0x250] sm:$0xff]  ;;  %v292_v11 = vld [vmem:[#allocation2 + $0x240] sm:$0xff]  ;;  %v305_v26 = vld [vmem:[#allocation2 + $0x2a8] sm:$0xff] }
  0x29   :  { %211 = vmatpush.msrb.mxu3 %v84_v44  ;;  %350 = vmatpush.msrb.mxu1 %v270_v46  ;;  %v222_v10 = vld [vmem:[#allocation2 + $0x10] sm:$0xff]  ;;  %v220_v13 = vld [vmem:[#allocation2] sm:$0xff]  ;;  %v271_v27 = vld [vmem:[#allocation2 + $0x198] sm:$0xff] }
  0x2a   :  { %961 = vmatmul.msk.f32.vlgmr.msrb.gmra.mxu3 %vm119_vm1, %v80_v21  ;;  %331 = vmatpush.msrb.mxu0 %v236_v47  ;;  %v254_v12 = vld [vmem:[#allocation2 + $0x110] sm:$0xff]  ;;  %v252_v15 = vld [vmem:[#allocation2 + $0x100] sm:$0xff]  ;;  %v277_v21 = vld [vmem:[#allocation2 + $0x1c8] sm:$0xff] }
  0x2b   :  { %351 = vmatpush.msrb.mxu1 %v268_v49  ;;  %398 = vmatpush.msra.mxu3 %v318_v52  ;;  %v303_v28 = vld [vmem:[#allocation2 + $0x298] sm:$0xff]  ;;  %v269_v29 = vld [vmem:[#allocation2 + $0x188] sm:$0xff]  ;;  %v290_v40 = vld [vmem:[#allocation2 + $0x230] sm:$0xff] }
  0x2c   :  { %332 = vmatpush.msrb.mxu0 %v234_v50  ;;  %371 = vmatpush.msra.mxu2 %v300_v59  ;;  %v301_v30 = vld [vmem:[#allocation2 + $0x288] sm:$0xff]  ;;  %v267_v31 = vld [vmem:[#allocation2 + $0x178] sm:$0xff]  ;;  %v288_v44 = vld [vmem:[#allocation2 + $0x220] sm:$0xff] }
  0x2d   :  { %352 = vmatpush.msrb.mxu1 %v266_v53  ;;  %399 = vmatpush.msra.mxu3 %v316_v56  ;;  %v299_v32 = vld [vmem:[#allocation2 + $0x278] sm:$0xff]  ;;  %v265_v33 = vld [vmem:[#allocation2 + $0x168] sm:$0xff]  ;;  %v286_v48 = vld [vmem:[#allocation2 + $0x210] sm:$0xff] }
  0x2e   :  { %333 = vmatpush.msrb.mxu0 %v232_v54  ;;  %372 = vmatpush.msra.mxu2 %v298_v63  ;;  %v297_v34 = vld [vmem:[#allocation2 + $0x268] sm:$0xff]  ;;  %v263_v35 = vld [vmem:[#allocation2 + $0x158] sm:$0xff]  ;;  %v284_v51 = vld [vmem:[#allocation2 + $0x200] sm:$0xff] }
  0x2f   :  { %353 = vmatpush.msrb.mxu1 %v264_v57  ;;  %404 = vmatpush.msrb.mxu3 %v251_v60  ;;  %v295_v36 = vld [vmem:[#allocation2 + $0x258] sm:$0xff]  ;;  %v261_v37 = vld [vmem:[#allocation2 + $0x148] sm:$0xff] }
  0x30   :  { %334 = vmatpush.msrb.mxu0 %v230_v58  ;;  %373 = vmatpush.msra.mxu2 %v296_v3  ;;  %v259_v38 = vld [vmem:[#allocation2 + $0x138] sm:$0xff]  ;;  %v257_v39 = vld [vmem:[#allocation2 + $0x128] sm:$0xff] }
  0x31   :  { %354 = vmatpush.msrb.mxu1 %v262_v61  ;;  %405 = vmatpush.msrb.mxu3 %v249_v0  ;;  %v243_v41 = vld [vmem:[#allocation2 + $0xb8] sm:$0xff]  ;;  %v293_v42 = vld [vmem:[#allocation2 + $0x248] sm:$0xff] }
  0x32   :  { %335 = vmatpush.msrb.mxu0 %v228_v62  ;;  %374 = vmatpush.msra.mxu2 %v294_v7  ;;  %v255_v43 = vld [vmem:[#allocation2 + $0x118] sm:$0xff]  ;;  %v241_v45 = vld [vmem:[#allocation2 + $0xa8] sm:$0xff] }
  0x33   :  { %355 = vmatpush.msrb.mxu1 %v260_v1  ;;  %406 = vmatpush.msrb.mxu3 %v247_v4  ;;  %v291_v46 = vld [vmem:[#allocation2 + $0x238] sm:$0xff]  ;;  %v253_v47 = vld [vmem:[#allocation2 + $0x108] sm:$0xff]  ;;  %v1240_v1 = vld [vmem:[%s1431_s3] sm:$0xf] }
  0x34   :  { %336 = vmatpush.msrb.mxu0 %v226_v2  ;;  %375 = vmatpush.msra.mxu2 %v292_v11  ;;  %v239_v49 = vld [vmem:[#allocation2 + $0x98] sm:$0xff]  ;;  %v289_v50 = vld [vmem:[#allocation2 + $0x228] sm:$0xff]  ;;  %v111_v2 = vperm.slane %v1240_v1, 0  ;;  %v112_v3 = vperm.slane %v1240_v1, 1  ;;  %v113_v11 = vperm.slane %v1240_v1, 2 }
  0x35   :  { %356 = vmatpush.msrb.mxu1 %v258_v5  ;;  %407 = vmatpush.msrb.mxu3 %v245_v8  ;;  %v237_v52 = vld [vmem:[#allocation2 + $0x88] sm:$0xff]  ;;  %v287_v53 = vld [vmem:[#allocation2 + $0x218] sm:$0xff] }
  0x36   :  { %337 = vmatpush.msrb.mxu0 %v224_v6  ;;  %376 = vmatpush.msra.mxu2 %v290_v40  ;;  %v319_v54 = vld [vmem:[#allocation2 + $0x318] sm:$0xff]  ;;  %v285_v56 = vld [vmem:[#allocation2 + $0x208] sm:$0xff]  ;;  %v502_v40 = vld [vmem:[#allocation5 + $0x90] sm:$0xff] }
  0x37   :  { %357 = vmatpush.msrb.mxu1 %v256_v9  ;;  %408 = vmatpush.msrb.mxu3 %v243_v41  ;;  %v235_v55 = vld [vmem:[#allocation2 + $0x78] sm:$0xff]  ;;  %v317_v57 = vld [vmem:[#allocation2 + $0x308] sm:$0xff]  ;;  %v578_v9 = vld [vmem:[#allocation5 + $0x2f0] sm:$0xff] }
  0x38   :  { %338 = vmatpush.msrb.mxu0 %v222_v10  ;;  %377 = vmatpush.msra.mxu2 %v288_v44  ;;  %v233_v58 = vld [vmem:[#allocation2 + $0x68] sm:$0xff]  ;;  %v231_v59 = vld [vmem:[#allocation2 + $0x58] sm:$0xff]  ;;  %v500_v44 = vld [vmem:[#allocation5 + $0x80] sm:$0xff] }
  0x39   :  { %358 = vmatpush.msrb.mxu1 %v254_v12  ;;  %409 = vmatpush.msrb.mxu3 %v241_v45  ;;  %v229_v60 = vld [vmem:[#allocation2 + $0x48] sm:$0xff]  ;;  %v227_v61 = vld [vmem:[#allocation2 + $0x38] sm:$0xff]  ;;  %v582_v12 = vld [vmem:[#allocation5 + $0x310] sm:$0xff] }
  0x3a   :  { %339 = vmatpush.msrb.mxu0 %v220_v13  ;;  %378 = vmatpush.msra.mxu2 %v286_v48  ;;  %v225_v62 = vld [vmem:[#allocation2 + $0x28] sm:$0xff]  ;;  %v223_v63 = vld [vmem:[#allocation2 + $0x18] sm:$0xff]  ;;  %v576_v13 = vld [vmem:[#allocation5 + $0x2e0] sm:$0xff] }
  0x3b   :  { %359 = vmatpush.msrb.mxu1 %v252_v15  ;;  %410 = vmatpush.msrb.mxu3 %v239_v49  ;;  %v221_v0 = vld [vmem:[#allocation2 + $0x8] sm:$0xff]  ;;  %v558_v45 = vld [vmem:[#allocation5 + $0x250] sm:$0xff]  ;;  %v556_v49 = vld [vmem:[#allocation5 + $0x240] sm:$0xff] }
  0x3c   :  { %424 = vmatpush.msra.mxu0 %v283_v14  ;;  %379 = vmatpush.msra.mxu2 %v284_v51  ;;  %v580_v14 = vld [vmem:[#allocation5 + $0x300] sm:$0xff]  ;;  %v505_v41 = vld [vmem:[#allocation5 + $0xa8] sm:$0xff]  ;;  %v498_v48 = vld [vmem:[#allocation5 + $0x70] sm:$0xff] }
  0x3d   :  { %444 = vmatpush.msra.mxu1 %v315_v16  ;;  %411 = vmatpush.msrb.mxu3 %v237_v52  ;;  %v574_v16 = vld [vmem:[#allocation5 + $0x2d0] sm:$0xff]  ;;  %v496_v52 = vld [vmem:[#allocation5 + $0x60] sm:$0xff] }
  0x3e   :  { %425 = vmatpush.msra.mxu0 %v281_v17  ;;  %478 = vmatpush.msrb.mxu2 %v319_v54  ;;  %v542_v51 = vld [vmem:[#allocation5 + $0x1d0] sm:$0xff]  ;;  %v499_v54 = vld [vmem:[#allocation5 + $0x78] sm:$0xff] }
  0x3f   :  { %445 = vmatpush.msra.mxu1 %v313_v18  ;;  %412 = vmatpush.msrb.mxu3 %v235_v55  ;;  %v572_v18 = vld [vmem:[#allocation5 + $0x2c0] sm:$0xff] }
  0x40   :  { %426 = vmatpush.msra.mxu0 %v279_v19  ;;  %479 = vmatpush.msrb.mxu2 %v317_v57  ;;  %v540_v55 = vld [vmem:[#allocation5 + $0x1c0] sm:$0xff] }
  0x41   :  { %446 = vmatpush.msra.mxu1 %v311_v20  ;;  %413 = vmatpush.msrb.mxu3 %v233_v58  ;;  %v514_v20 = vld [vmem:[#allocation5 + $0xf0] sm:$0xff]  ;;  %v552_v57 = vld [vmem:[#allocation5 + $0x220] sm:$0xff]  ;;  %v497_v58 = vld [vmem:[#allocation5 + $0x68] sm:$0xff] }
  0x42   :  { %427 = vmatpush.msra.mxu0 %v277_v21  ;;  %v570_v21 = vld [vmem:[#allocation5 + $0x2b0] sm:$0xff] }
  0x43   :  { %447 = vmatpush.msra.mxu1 %v309_v22  ;;  %414 = vmatpush.msrb.mxu3 %v231_v59  ;;  %v512_v22 = vld [vmem:[#allocation5 + $0xe0] sm:$0xff]  ;;  %v538_v59 = vld [vmem:[#allocation5 + $0x1b0] sm:$0xff] }
  0x44   :  { %428 = vmatpush.msra.mxu0 %v275_v23  ;;  %v515_v23 = vld [vmem:[#allocation5 + $0xf8] sm:$0xff] }
  0x45   :  { %448 = vmatpush.msra.mxu1 %v307_v24  ;;  %415 = vmatpush.msrb.mxu3 %v229_v60  ;;  %v568_v24 = vld [vmem:[#allocation5 + $0x2a0] sm:$0xff] }
  0x46   :  { %429 = vmatpush.msra.mxu0 %v273_v25  ;;  %v510_v25 = vld [vmem:[#allocation5 + $0xd0] sm:$0xff]  ;;  %v492_v60 = vld [vmem:[#allocation5 + $0x40] sm:$0xff] }
  0x47   :  { %449 = vmatpush.msra.mxu1 %v305_v26  ;;  %416 = vmatpush.msrb.mxu3 %v227_v61  ;;  %v513_v26 = vld [vmem:[#allocation5 + $0xe8] sm:$0xff]  ;;  %v550_v61 = vld [vmem:[#allocation5 + $0x210] sm:$0xff] }
  0x48   :  { %430 = vmatpush.msra.mxu0 %v271_v27  ;;  %v566_v27 = vld [vmem:[#allocation5 + $0x290] sm:$0xff] }
  0x49   :  { %450 = vmatpush.msra.mxu1 %v303_v28  ;;  %417 = vmatpush.msrb.mxu3 %v225_v62  ;;  %v508_v28 = vld [vmem:[#allocation5 + $0xc0] sm:$0xff]  ;;  %v495_v62 = vld [vmem:[#allocation5 + $0x58] sm:$0xff] }
  0x4a   :  { %431 = vmatpush.msra.mxu0 %v269_v29  ;;  %v511_v29 = vld [vmem:[#allocation5 + $0xd8] sm:$0xff] }
  0x4b   :  { %451 = vmatpush.msra.mxu1 %v301_v30  ;;  %418 = vmatpush.msrb.mxu3 %v223_v63  ;;  %v564_v30 = vld [vmem:[#allocation5 + $0x280] sm:$0xff] }
  0x4c   :  { %432 = vmatpush.msra.mxu0 %v267_v31  ;;  %v114_v31 = vperm.slane %v1240_v1, 3  ;;  %v536_v63 = vld [vmem:[#allocation5 + $0x1a0] sm:$0xff] }
  0x4d   :  { %452 = vmatpush.msra.mxu1 %v299_v32  ;;  %419 = vmatpush.msrb.mxu3 %v221_v0  ;;  %v506_v32 = vld [vmem:[#allocation5 + $0xb0] sm:$0xff]  ;;  %v548_v1 = vld [vmem:[#allocation5 + $0x200] sm:$0xff] }
  0x4e   :  { %433 = vmatpush.msra.mxu0 %v265_v33  ;;  %v509_v33 = vld [vmem:[#allocation5 + $0xc8] sm:$0xff]  ;;  %v490_v0 = vld [vmem:[#allocation5 + $0x30] sm:$0xff] }
  0x4f   :  { %453 = vmatpush.msra.mxu1 %v297_v34  ;;  %v562_v34 = vld [vmem:[#allocation5 + $0x270] sm:$0xff] }
  0x50   :  { %434 = vmatpush.msra.mxu0 %v263_v35  ;;  %v504_v35 = vld [vmem:[#allocation5 + $0xa0] sm:$0xff] }
  0x51   :  { %454 = vmatpush.msra.mxu1 %v295_v36  ;;  %v507_v36 = vld [vmem:[#allocation5 + $0xb8] sm:$0xff] }
  0x52   :  { %435 = vmatpush.msra.mxu0 %v261_v37 }
  0x53   :  { %455 = vmatpush.msra.mxu1 %v293_v42 }
  0x54   :  { %436 = vmatpush.msra.mxu0 %v259_v38  ;;  %v560_v38 = vld [vmem:[#allocation5 + $0x260] sm:$0xff] }
  0x55   :  { %456 = vmatpush.msra.mxu1 %v291_v46  ;;  %v503_v46 = vld [vmem:[#allocation5 + $0x98] sm:$0xff] }
  0x56   :  { %437 = vmatpush.msra.mxu0 %v257_v39 }
  0x57   :  { %457 = vmatpush.msra.mxu1 %v289_v50  ;;  %v501_v50 = vld [vmem:[#allocation5 + $0x88] sm:$0xff] }
  0x58   :  { %438 = vmatpush.msra.mxu0 %v255_v43  ;;  %v546_v43 = vld [vmem:[#allocation5 + $0x1f0] sm:$0xff] }
  0x59   :  { %458 = vmatpush.msra.mxu1 %v287_v53  ;;  %v554_v53 = vld [vmem:[#allocation5 + $0x230] sm:$0xff] }
  0x5a   :  { %439 = vmatpush.msra.mxu0 %v253_v47  ;;  %v544_v47 = vld [vmem:[#allocation5 + $0x1e0] sm:$0xff] }
  0x5b   :  { %459 = vmatpush.msra.mxu1 %v285_v56  ;;  %v494_v56 = vld [vmem:[#allocation5 + $0x50] sm:$0xff] }
  0x98   :  { %v153_v4 = vpop.f32.mrf.mxu0  ;;  %v173_v6 = vpop.f32.mrf.mxu1 }
  0x99   :  { %v154_v5 = vadd.f32 %v153_v4, %v111_v2  ;;  %v174_v7 = vadd.f32 %v173_v6, %v112_v3  ;;  %v493_v2 = vld [vmem:[#allocation5 + $0x48] sm:$0xff]  ;;  %v534_v3 = vld [vmem:[#allocation5 + $0x190] sm:$0xff]  ;;  %v488_v4 = vld [vmem:[#allocation5 + $0x20] sm:$0xff] }
  0x9a   :  { %v532_v6 = vld [vmem:[#allocation5 + $0x180] sm:$0xff] }
  0x9b   :  { %v1244_v8 = vmax.f32 %v154_v5, 0.0  ;;  %v1246_v10 = vmax.f32 %v174_v7, 0.0  ;;  %v491_v5 = vld [vmem:[#allocation5 + $0x38] sm:$0xff]  ;;  %v486_v7 = vld [vmem:[#allocation5 + $0x10] sm:$0xff] }
  0x9d   :  { %340 = vmatmul.f32.vlgmr.msrb.gmra.mxu0 %v1244_v8  ;;  %360 = vmatmul.f32.vlgmr.msrb.gmra.mxu1 %v1246_v10 }
  0x9e   :  { %624 = vmatpush.msrb.mxu0 %v578_v9  ;;  %658 = vmatpush.msrb.mxu1 %v582_v12  ;;  %v489_v9 = vld [vmem:[#allocation5 + $0x28] sm:$0xff]  ;;  %v484_v12 = vld [vmem:[#allocation5] sm:$0xff] }
  0x9f   :  { %v193_v15 = vpop.f32.mrf.mxu3 }
  0xa0   :  { %v194_v17 = vadd.f32 %v193_v15, %v113_v11  ;;  %625 = vmatpush.msrb.mxu0 %v576_v13  ;;  %659 = vmatpush.msrb.mxu1 %v580_v14  ;;  %v530_v11 = vld [vmem:[#allocation5 + $0x170] sm:$0xff]  ;;  %v487_v13 = vld [vmem:[#allocation5 + $0x18] sm:$0xff]  ;;  %v528_v14 = vld [vmem:[#allocation5 + $0x160] sm:$0xff] }
  0xa1   :  { %v547_v15 = vld [vmem:[#allocation5 + $0x1f8] sm:$0xff] }
  0xa2   :  { %v1251_v19 = vmax.f32 %v194_v17, 0.0  ;;  %626 = vmatpush.msrb.mxu0 %v574_v16  ;;  %v485_v16 = vld [vmem:[#allocation5 + $0x8] sm:$0xff]  ;;  %v526_v17 = vld [vmem:[#allocation5 + $0x150] sm:$0xff] }
  0xa4   :  { %380 = vmatmul.f32.vlgmr.msra.gmra.mxu2 %v1251_v19  ;;  %627 = vmatpush.msrb.mxu0 %v572_v18  ;;  %v545_v18 = vld [vmem:[#allocation5 + $0x1e8] sm:$0xff] }
  0xa5   :  { %584 = vmatpush.msra.mxu2 %v514_v20  ;;  %440 = vmatmul.f32.vlgmr.msra.gmra.mxu0 %v1246_v10  ;;  %v583_v20 = vld [vmem:[#allocation5 + $0x318] sm:$0xff] }
  0xa6   :  { %460 = vmatmul.f32.vlgmr.msra.gmra.mxu1 %v1251_v19  ;;  %628 = vmatpush.msrb.mxu0 %v570_v21  ;;  %v524_v21 = vld [vmem:[#allocation5 + $0x140] sm:$0xff] }
  0xa7   :  { %585 = vmatpush.msra.mxu2 %v512_v22  ;;  %664 = vmatpush.msra.mxu1 %v515_v23  ;;  %v543_v22 = vld [vmem:[#allocation5 + $0x1d8] sm:$0xff]  ;;  %v581_v23 = vld [vmem:[#allocation5 + $0x308] sm:$0xff] }
  0xa8   :  { %629 = vmatpush.msrb.mxu0 %v568_v24  ;;  %v522_v24 = vld [vmem:[#allocation5 + $0x130] sm:$0xff] }
  0xa9   :  { %586 = vmatpush.msra.mxu2 %v510_v25  ;;  %665 = vmatpush.msra.mxu1 %v513_v26  ;;  %v541_v25 = vld [vmem:[#allocation5 + $0x1c8] sm:$0xff]  ;;  %v520_v26 = vld [vmem:[#allocation5 + $0x120] sm:$0xff] }
  0xaa   :  { %630 = vmatpush.msrb.mxu0 %v566_v27  ;;  %v539_v27 = vld [vmem:[#allocation5 + $0x1b8] sm:$0xff] }
  0xab   :  { %587 = vmatpush.msra.mxu2 %v508_v28  ;;  %666 = vmatpush.msra.mxu1 %v511_v29  ;;  %v518_v28 = vld [vmem:[#allocation5 + $0x110] sm:$0xff]  ;;  %v537_v29 = vld [vmem:[#allocation5 + $0x1a8] sm:$0xff] }
  0xac   :  { %631 = vmatpush.msrb.mxu0 %v564_v30  ;;  %v516_v30 = vld [vmem:[#allocation5 + $0x100] sm:$0xff] }
  0xad   :  { %v213_v37 = vpop.f32.mrf.mxu3  ;;  %588 = vmatpush.msra.mxu2 %v506_v32  ;;  %667 = vmatpush.msra.mxu1 %v509_v33  ;;  %v533_v32 = vld [vmem:[#allocation5 + $0x188] sm:$0xff] }
  0xae   :  { %v214_v39 = vadd.f32 %v213_v37, %v114_v31  ;;  %632 = vmatpush.msrb.mxu0 %v562_v34  ;;  %v579_v31 = vld [vmem:[#allocation5 + $0x2f8] sm:$0xff]  ;;  %v577_v33 = vld [vmem:[#allocation5 + $0x2e8] sm:$0xff] }
  0xaf   :  { %589 = vmatpush.msra.mxu2 %v504_v35  ;;  %668 = vmatpush.msra.mxu1 %v507_v36  ;;  %v531_v34 = vld [vmem:[#allocation5 + $0x178] sm:$0xff]  ;;  %v529_v36 = vld [vmem:[#allocation5 + $0x168] sm:$0xff] }
  0xb0   :  { %v1257_v42 = vmax.f32 %v214_v39, 0.0  ;;  %633 = vmatpush.msrb.mxu0 %v560_v38  ;;  %v575_v35 = vld [vmem:[#allocation5 + $0x2d8] sm:$0xff]  ;;  %v573_v37 = vld [vmem:[#allocation5 + $0x2c8] sm:$0xff] }
  0xb1   :  { %590 = vmatpush.msra.mxu2 %v502_v40  ;;  %669 = vmatpush.msra.mxu1 %v505_v41  ;;  %v527_v38 = vld [vmem:[#allocation5 + $0x158] sm:$0xff]  ;;  %v525_v40 = vld [vmem:[#allocation5 + $0x148] sm:$0xff] }
  0xb2   :  { %962 = vmatmul.msk.f32.vlgmr.msra.gmra.mxu3 %vm320_vm2, %v1257_v42  ;;  %963 = vmatmul.msk.f32.vlgmr.msrb.gmra.mxu2 %vm320_vm2, %v1257_v42  ;;  %v571_v39 = vld [vmem:[#allocation5 + $0x2b8] sm:$0xff]  ;;  %v569_v41 = vld [vmem:[#allocation5 + $0x2a8] sm:$0xff] }
  0xb3   :  { %604 = vmatpush.msra.mxu3 %v546_v43  ;;  %964 = vmatmul.msk.f32.vlgmr.msrb.gmra.mxu1 %vm320_vm2, %v1257_v42  ;;  %v567_v43 = vld [vmem:[#allocation5 + $0x298] sm:$0xff] }
  0xb4   :  { %591 = vmatpush.msra.mxu2 %v500_v44  ;;  %634 = vmatpush.msrb.mxu0 %v558_v45  ;;  %v521_v44 = vld [vmem:[#allocation5 + $0x128] sm:$0xff] }
  0xb5   :  { %670 = vmatpush.msra.mxu1 %v503_v46  ;;  %605 = vmatpush.msra.mxu3 %v544_v47  ;;  %v565_v45 = vld [vmem:[#allocation5 + $0x288] sm:$0xff]  ;;  %v519_v46 = vld [vmem:[#allocation5 + $0x118] sm:$0xff] }
  0xb6   :  { %592 = vmatpush.msra.mxu2 %v498_v48  ;;  %635 = vmatpush.msrb.mxu0 %v556_v49  ;;  %v563_v47 = vld [vmem:[#allocation5 + $0x278] sm:$0xff]  ;;  %v517_v48 = vld [vmem:[#allocation5 + $0x108] sm:$0xff] }
  0xb7   :  { %671 = vmatpush.msra.mxu1 %v501_v50  ;;  %606 = vmatpush.msra.mxu3 %v542_v51  ;;  %v561_v49 = vld [vmem:[#allocation5 + $0x268] sm:$0xff]  ;;  %v559_v50 = vld [vmem:[#allocation5 + $0x258] sm:$0xff] }
  0xb8   :  { %593 = vmatpush.msra.mxu2 %v496_v52  ;;  %636 = vmatpush.msrb.mxu0 %v554_v53  ;;  %v557_v51 = vld [vmem:[#allocation5 + $0x248] sm:$0xff]  ;;  %v555_v52 = vld [vmem:[#allocation5 + $0x238] sm:$0xff] }
  0xb9   :  { %672 = vmatpush.msra.mxu1 %v499_v54  ;;  %607 = vmatpush.msra.mxu3 %v540_v55  ;;  %v553_v53 = vld [vmem:[#allocation5 + $0x228] sm:$0xff]  ;;  %v551_v54 = vld [vmem:[#allocation5 + $0x218] sm:$0xff] }
  0xba   :  { %594 = vmatpush.msra.mxu2 %v494_v56  ;;  %637 = vmatpush.msrb.mxu0 %v552_v57  ;;  %v549_v55 = vld [vmem:[#allocation5 + $0x208] sm:$0xff]  ;;  %v771_v56 = vld [vmem:[%s1435_s7 + $0x78] sm:$0xff] }
  0xbb   :  { %673 = vmatpush.msra.mxu1 %v497_v58  ;;  %420 = vmatmul.f32.vlgmr.msrb.gmra.mxu3 %v1244_v8  ;;  %v769_v57 = vld [vmem:[%s1435_s7 + $0x68] sm:$0xff]  ;;  %v768_v58 = vld [vmem:[%s1435_s7 + $0x60] sm:$0xff] }
  0xbc   :  { %608 = vmatpush.msra.mxu3 %v538_v59  ;;  %595 = vmatpush.msra.mxu2 %v492_v60  ;;  %v766_v59 = vld [vmem:[%s1435_s7 + $0x50] sm:$0xff]  ;;  %v765_v60 = vld [vmem:[%s1435_s7 + $0x48] sm:$0xff] }
  0xbd   :  { %638 = vmatpush.msrb.mxu0 %v550_v61  ;;  %674 = vmatpush.msra.mxu1 %v495_v62  ;;  %v764_v61 = vld [vmem:[%s1435_s7 + $0x40] sm:$0xff]  ;;  %v763_v62 = vld [vmem:[%s1435_s7 + $0x38] sm:$0xff] }
  0xbe   :  { %609 = vmatpush.msra.mxu3 %v536_v63  ;;  %596 = vmatpush.msra.mxu2 %v490_v0  ;;  %v762_v63 = vld [vmem:[%s1435_s7 + $0x30] sm:$0xff]  ;;  %v761_v0 = vld [vmem:[%s1435_s7 + $0x28] sm:$0xff] }
  0xbf   :  { %639 = vmatpush.msrb.mxu0 %v548_v1  ;;  %675 = vmatpush.msra.mxu1 %v493_v2  ;;  %v760_v1 = vld [vmem:[%s1435_s7 + $0x20] sm:$0xff]  ;;  %v759_v2 = vld [vmem:[%s1435_s7 + $0x18] sm:$0xff] }
  0xc0   :  { %610 = vmatpush.msra.mxu3 %v534_v3  ;;  %640 = vmatmul.f32.vlgmr.msrb.gmra.mxu0 %v1251_v19  ;;  %v758_v3 = vld [vmem:[%s1435_s7 + $0x10] sm:$0xff] }
  0xc1   :  { %597 = vmatpush.msra.mxu2 %v488_v4  ;;  %676 = vmatpush.msra.mxu1 %v491_v5  ;;  %v757_v4 = vld [vmem:[%s1435_s7 + $0x8] sm:$0xff]  ;;  %v756_v5 = vld [vmem:[%s1435_s7] sm:$0xff] }
  0xc2   :  { %611 = vmatpush.msra.mxu3 %v532_v6  ;;  %789 = vmatpush.msra.mxu0 %v771_v56  ;;  %v833_v56 = vld [vmem:[%s1438_s10] sm:$0xff] }
  0xc3   :  { %598 = vmatpush.msra.mxu2 %v486_v7  ;;  %677 = vmatpush.msra.mxu1 %v489_v9 }
  0xc4   :  { %612 = vmatpush.msra.mxu3 %v530_v11 }
  0xc5   :  { %599 = vmatpush.msra.mxu2 %v484_v12  ;;  %678 = vmatpush.msra.mxu1 %v487_v13  ;;  %v780_v12 = vld [vmem:[%s1435_s7 + $0xc0] sm:$0xff]  ;;  %v779_v13 = vld [vmem:[%s1435_s7 + $0xb8] sm:$0xff] }
  0xc6   :  { %613 = vmatpush.msra.mxu3 %v528_v14  ;;  %600 = vmatmul.f32.vlgmr.msra.gmra.mxu2 %v1244_v8 }
  0xc7   :  { %684 = vmatpush.msrb.mxu2 %v547_v15  ;;  %679 = vmatpush.msra.mxu1 %v485_v16  ;;  %v778_v15 = vld [vmem:[%s1435_s7 + $0xb0] sm:$0xff] }
  0xc8   :  { %614 = vmatpush.msra.mxu3 %v526_v17  ;;  %680 = vmatmul.f32.vlgmr.msra.gmra.mxu1 %v1244_v8  ;;  %v535_v8 = vld [vmem:[#allocation5 + $0x198] sm:$0xff] }
  0xc9   :  { %685 = vmatpush.msrb.mxu2 %v545_v18  ;;  %738 = vmatpush.msrb.mxu1 %v583_v20 }
  0xca   :  { %615 = vmatpush.msra.mxu3 %v524_v21 }
  0xcb   :  { %686 = vmatpush.msrb.mxu2 %v543_v22  ;;  %739 = vmatpush.msrb.mxu1 %v581_v23  ;;  %v777_v22 = vld [vmem:[%s1435_s7 + $0xa8] sm:$0xff] }
  0xcc   :  { %616 = vmatpush.msra.mxu3 %v522_v24 }
  0xcd   :  { %687 = vmatpush.msrb.mxu2 %v541_v25  ;;  %816 = vmatpush.msra.mxu1 %v780_v12  ;;  %v776_v25 = vld [vmem:[%s1435_s7 + $0xa0] sm:$0xff] }
  0xce   :  { %617 = vmatpush.msra.mxu3 %v520_v26 }
  0xcf   :  { %688 = vmatpush.msrb.mxu2 %v539_v27  ;;  %817 = vmatpush.msra.mxu1 %v779_v13  ;;  %v746_v27 = vld [vmem:[%s1434_s6] sm:$0x3]  ;;  %v897_v13 = vld [vmem:[%s1440_s12 + $0x18] sm:$0xff] }
  0xd0   :  { %618 = vmatpush.msra.mxu3 %v518_v28  ;;  %965 = vmatmul.msk.f32.vlgmr.msrb.gmra.mxu1 %vm320_vm2, %v1257_v42  ;;  %v523_v42 = vld [vmem:[#allocation5 + $0x138] sm:$0xff] }
  0xd1   :  { %689 = vmatpush.msrb.mxu2 %v537_v29  ;;  %818 = vmatpush.msra.mxu1 %v778_v15  ;;  %v895_v15 = vld [vmem:[%s1440_s12 + $0x8] sm:$0xff] }
  0xd2   :  { %619 = vmatpush.msra.mxu3 %v516_v30  ;;  %v775_v30 = vld [vmem:[%s1435_s7 + $0x98] sm:$0xff] }
  0xd3   :  { %690 = vmatpush.msrb.mxu2 %v535_v8  ;;  %620 = vmatmul.f32.vlgmr.msra.gmra.mxu3 %v1246_v10 }
  0xd4   :  { %704 = vmatpush.msrb.mxu3 %v579_v31  ;;  %819 = vmatpush.msra.mxu1 %v777_v22 }
  0xd5   :  { %691 = vmatpush.msrb.mxu2 %v533_v32 }
  0xd6   :  { %705 = vmatpush.msrb.mxu3 %v577_v33  ;;  %820 = vmatpush.msra.mxu1 %v776_v25  ;;  %v748_v33 = vperm.slane %v746_v27, 0  ;;  %v977_v25 = vld [vmem:[%s1441_s13] ss:$0 sm:$0xff] }
  0xd7   :  { %692 = vmatpush.msrb.mxu2 %v531_v34  ;;  %v774_v34 = vld [vmem:[%s1435_s7 + $0x90] sm:$0xff] }
  0xd8   :  { %706 = vmatpush.msrb.mxu3 %v575_v35  ;;  %821 = vmatpush.msra.mxu1 %v775_v30 }
  0xd9   :  { %693 = vmatpush.msrb.mxu2 %v529_v36  ;;  %v773_v36 = vld [vmem:[%s1435_s7 + $0x88] sm:$0xff] }
  0xda   :  { %707 = vmatpush.msrb.mxu3 %v573_v37  ;;  %822 = vmatpush.msra.mxu1 %v774_v34 }
  0xdb   :  { %694 = vmatpush.msrb.mxu2 %v527_v38  ;;  %v772_v38 = vld [vmem:[%s1435_s7 + $0x80] sm:$0xff] }
  0xdc   :  { %708 = vmatpush.msrb.mxu3 %v571_v39  ;;  %823 = vmatpush.msra.mxu1 %v773_v36 }
  0xdd   :  { %695 = vmatpush.msrb.mxu2 %v525_v40 }
  0xde   :  { %709 = vmatpush.msrb.mxu3 %v569_v41  ;;  %824 = vmatpush.msra.mxu1 %v772_v38 }
  0xdf   :  { %696 = vmatpush.msrb.mxu2 %v523_v42 }
  0xe0   :  { %710 = vmatpush.msrb.mxu3 %v567_v43 }
  0xe1   :  { %697 = vmatpush.msrb.mxu2 %v521_v44 }
  0xe2   :  { %711 = vmatpush.msrb.mxu3 %v565_v45 }
  0xe3   :  { %698 = vmatpush.msrb.mxu2 %v519_v46 }
  0xe4   :  { %712 = vmatpush.msrb.mxu3 %v563_v47 }
  0xe5   :  { %699 = vmatpush.msrb.mxu2 %v517_v48 }
  0xe6   :  { %700 = vmatmul.f32.vlgmr.msrb.gmra.mxu2 %v1246_v10  ;;  %713 = vmatpush.msrb.mxu3 %v561_v49  ;;  %v770_v10 = vld [vmem:[%s1435_s7 + $0x70] sm:$0xff] }
  0xe7   :  { %790 = vmatpush.msra.mxu0 %v770_v10  ;;  %v831_v10 = vld [vmem:[%s1437_s9] sm:$0xff] }
  0xe8   :  { %714 = vmatpush.msrb.mxu3 %v559_v50  ;;  %v749_v50 = vperm.slane %v746_v27, 1 }
  0xe9   :  { %791 = vmatpush.msra.mxu0 %v769_v57  ;;  %v830_v57 = vld [vmem:[%s1428_s0] sm:$0xff] }
  0xea   :  { %715 = vmatpush.msrb.mxu3 %v557_v51 }
  0xeb   :  { %792 = vmatpush.msra.mxu0 %v768_v58  ;;  %v909_v58 = vld [vmem:[%s1440_s12 + $0x78] sm:$0xff] }
  0xec   :  { %716 = vmatpush.msrb.mxu3 %v555_v52 }
  0xee   :  { %717 = vmatpush.msrb.mxu3 %v553_v53 }
  0xf0   :  { %718 = vmatpush.msrb.mxu3 %v551_v54  ;;  %v834_v54 = vld [vmem:[%s1438_s10 + $0x8] sm:$0xff] }
  0xf1   :  { %852 = vmatpush.msra.mxu2 %v834_v54 }
  0xf2   :  { %719 = vmatpush.msrb.mxu3 %v549_v55  ;;  %v832_v55 = vld [vmem:[%s1437_s9 + $0x8] sm:$0x1f] }
  0xf3   :  { %720 = vmatmul.f32.vlgmr.msrb.gmra.mxu3 %v1251_v19  ;;  %v767_v19 = vld [vmem:[%s1435_s7 + $0x58] sm:$0xff]  ;;  %853 = vmatpush.msra.mxu2 %v833_v56 }
  0xf4   :  { %793 = vmatpush.msra.mxu0 %v767_v19  ;;  %968 = vmatpush.msk.msra.mxu3 %vm862_vm4, %v832_v55  ;;  %v908_v19 = vld [vmem:[%s1440_s12 + $0x70] sm:$0xff] }
  0xf5   :  { %914 = vmatpush.msrb.mxu2 %v909_v58 }
  0xf6   :  { %794 = vmatpush.msra.mxu0 %v766_v59  ;;  %881 = vmatpush.msra.mxu3 %v831_v10  ;;  %v907_v59 = vld [vmem:[%s1440_s12 + $0x68] sm:$0xff] }
  0xf7   :  { %915 = vmatpush.msrb.mxu2 %v908_v19 }
  0xf8   :  { %795 = vmatpush.msra.mxu0 %v765_v60  ;;  %v906_v60 = vld [vmem:[%s1440_s12 + $0x60] sm:$0xff] }
  0xf9   :  { %916 = vmatpush.msrb.mxu2 %v907_v59 }
  0xfa   :  { %796 = vmatpush.msra.mxu0 %v764_v61  ;;  %v905_v61 = vld [vmem:[%s1440_s12 + $0x58] sm:$0xff] }
  0xfb   :  { %969 = vmatmul.msk.f32.vlgmr.msra.gmra.mxu3 %vm858_vm5, %v830_v57  ;;  %917 = vmatpush.msrb.mxu2 %v906_v60 }
  0xfc   :  { %797 = vmatpush.msra.mxu0 %v763_v62  ;;  %v904_v62 = vld [vmem:[%s1440_s12 + $0x50] sm:$0xff] }
  0xfd   :  { %918 = vmatpush.msrb.mxu2 %v905_v61 }
  0xfe   :  { %798 = vmatpush.msra.mxu0 %v762_v63  ;;  %v903_v63 = vld [vmem:[%s1440_s12 + $0x48] sm:$0xff] }
  0xff   :  { %919 = vmatpush.msrb.mxu2 %v904_v62 }
 0x100   :  { %799 = vmatpush.msra.mxu0 %v761_v0  ;;  %v902_v0 = vld [vmem:[%s1440_s12 + $0x40] sm:$0xff] }
 0x101   :  { %920 = vmatpush.msrb.mxu2 %v903_v63 }
 0x102   :  { %800 = vmatpush.msra.mxu0 %v760_v1  ;;  %v901_v1 = vld [vmem:[%s1440_s12 + $0x38] sm:$0xff] }
 0x103   :  { %921 = vmatpush.msrb.mxu2 %v902_v0 }
 0x104   :  { %801 = vmatpush.msra.mxu0 %v759_v2  ;;  %v900_v2 = vld [vmem:[%s1440_s12 + $0x30] sm:$0xff] }
 0x105   :  { %922 = vmatpush.msrb.mxu2 %v901_v1 }
 0x106   :  { %802 = vmatpush.msra.mxu0 %v758_v3  ;;  %v899_v3 = vld [vmem:[%s1440_s12 + $0x28] sm:$0xff] }
 0x107   :  { %923 = vmatpush.msrb.mxu2 %v900_v2 }
 0x108   :  { %803 = vmatpush.msra.mxu0 %v757_v4  ;;  %v898_v4 = vld [vmem:[%s1440_s12 + $0x20] sm:$0xff] }
 0x109   :  { %924 = vmatpush.msrb.mxu2 %v899_v3 }
 0x10a   :  { %804 = vmatpush.msra.mxu0 %v756_v5  ;;  %v975_v5 = vld [vmem:[%s1436_s8] ss:$0 sm:$0xff] }
 0x10b   :  { %925 = vmatpush.msrb.mxu2 %v898_v4 }
 0x10d   :  { %926 = vmatpush.msrb.mxu2 %v897_v13 }
 0x11a   :  { %v341_v7 = vpop.f32.mrf.mxu0  ;;  %v361_v11 = vpop.f32.mrf.mxu1 }
 0x11b   :  { %v362_v21 = vadd.f32 %v361_v11, %v341_v7 }
 0x122   :  { %v441_v16 = vpop.f32.mrf.mxu0 }
 0x123   :  { %v461_v18 = vpop.f32.mrf.mxu1 }
 0x127   :  { %v381_v6 = vpop.f32.mrf.mxu2 }
 0x128   :  { %v382_v28 = vadd.f32 %v381_v6, %v362_v21 }
 0x130   :  { %v661_v8 = vpop.f32.mrf.mxu1 }
 0x135   :  { %v401_v9 = vpop.f32.mrf.mxu3  ;;  %v481_v14 = vpop.f32.mrf.mxu2 }
 0x136   :  { %v402_v31 = vadd.f32 %v401_v9, %v382_v28 }
 0x13d   :  { %v641_v26 = vpop.f32.mrf.mxu0 }
 0x13e   :  { %v421_v17 = vpop.f32.mrf.mxu3 }
 0x13f   :  { %v442_v41 = vadd.f32 %v441_v16, %v421_v17  ;;  %v894_v16 = vld [vmem:[%s1440_s12] sm:$0xff] }
 0x141   :  { %v462_v43 = vadd.f32 %v461_v18, %v442_v41  ;;  %v976_v18 = vld [vmem:[%s1439_s11] ss:$0 sm:$0xff] }
 0x143   :  { %v482_v48 = vadd.f32 %v481_v14, %v462_v43  ;;  %v896_v14 = vld [vmem:[%s1440_s12 + $0x10] sm:$0xff] }
 0x144   :  { %927 = vmatpush.msrb.mxu2 %v896_v14 }
 0x145   :  { %v681_v40 = vpop.f32.mrf.mxu1 }
 0x146   :  { %928 = vmatpush.msrb.mxu2 %v895_v15 }
 0x148   :  { %929 = vmatpush.msrb.mxu2 %v894_v16 }
 0x149   :  { %v601_v20 = vpop.f32.mrf.mxu2 }
 0x14d   :  { %v741_v47 = vpop.f32.mrf.mxu1 }
 0x156   :  { %v621_v23 = vpop.f32.mrf.mxu3 }
 0x157   :  { %v622_v24 = vadd.f32 %v621_v23, %v601_v20 }
 0x159   :  { %v642_v29 = vadd.f32 %v641_v26, %v622_v24 }
 0x15b   :  { %v662_v32 = vadd.f32 %v661_v8, %v642_v29 }
 0x15d   :  { %v744_v35 = vmax.f32 %v402_v31, %v662_v32 }
 0x15f   :  { %v752_v37 = vadd.f32 %v748_v33, %v744_v35 }
 0x161   :  { %v754_v39 = vmax.f32 %v752_v37, 0.0 }
 0x163   :  { %805 = vmatmul.f32.vlgmr.msra.gmra.mxu0 %v754_v39 }
 0x169   :  { %v701_v42 = vpop.f32.mrf.mxu2 }
 0x16a   :  { %v702_v44 = vadd.f32 %v701_v42, %v681_v40 }
 0x176   :  { %v721_v45 = vpop.f32.mrf.mxu3 }
 0x177   :  { %v722_v46 = vadd.f32 %v721_v45, %v702_v44 }
 0x179   :  { %v742_v49 = vadd.f32 %v741_v47, %v722_v46 }
 0x17b   :  { %v745_v51 = vmax.f32 %v482_v48, %v742_v49 }
 0x17d   :  { %v753_v52 = vadd.f32 %v749_v50, %v745_v51 }
 0x17e   :  { %v883_v17 = vpop.f32.mrf.mxu3 }
 0x17f   :  { %v755_v53 = vmax.f32 %v753_v52, 0.0 }
 0x181   :  { %966 = vmatmul.msk.f32.vlgmr.msra.gmra.mxu1 %vm785_vm3, %v755_v53 }
 0x1e0   :  { %v806_v6 = vpop.f32.mrf.mxu0 }
 0x1e1   :  { %v807_v7 = vadd.f32 %v975_v5, %v806_v6 }
 0x1fe   :  { %v826_v9 = vpop.f32.mrf.mxu1 }
 0x1ff   :  { %v827_v11 = vadd.f32 %v826_v9, %v807_v7 }
 0x201   :  { %v829_v12 = vmax.f32 %v827_v11, 0.0 }
 0x203   :  { %967 = vmatmul.msk.f32.vlgmr.msra.gmra.mxu2 %vm320_vm2, %v829_v12 }
 0x286   :  { %v855_v20 = vpop.f32.mrf.mxu2 }
 0x287   :  { %v884_v21 = vadd.f32 %v883_v17, %v855_v20 }
 0x289   :  { %v890_v22 = vadd.f32 %v976_v18, %v884_v21 }
 0x28b   :  { %v892_v23 = vmul.f32 0.01, %v890_v22  ;;  %vm891_vm6 = vcmp.gt.f32.partialorder %v890_v22, 0.0 }
 0x28d   :  { %v893_v24 = vsel %vm891_vm6, %v890_v22, %v892_v23 }
 0x28e   :  { %930 = vmatmul.f32.vlgmr.msrb.gmra.mxu2 %v893_v24 }
 0x311   :  { %v931_v26 = vpop.f32.mrf.mxu2 }
 0x312   :  { %v932_v27 = vadd.f32 %v977_v25, %v931_v26 }
 0x314   :  { %935 = vst.msk [vmem:[#allocation7] sm:$0xff] %vm934_vm7, %v932_v27 }
 0x315   :  { %946 = dma.vmem_to_hbm [thread:$0]  %s942_s16, 128, %s944_s17, [#allocation4]  }
 0x316   :  { %1054 = dma.done.wait [#allocation4], 128  }
 0x317   :  { %1055 = vsyncadd [#allocation4], 4294967168 }
 0x318   :  { %951 = vsyncpa [#allocation3], 1 }
 0x319   :  { %952 = vsyncpa [#allocation6], 1 }
 0x31a   :  { %953 = vsyncpa [#allocation4], 1 }

</bundles_post_ra>
